<compile_context>
chip_gen: v5e
topology: v5e:2x2
jax: 0.10.0
libtpu: 0.0.40
codegen_flags: <defaults>
</compile_context>

<pallas_src>
import jax
import jax.numpy as jnp
from jax.experimental import pallas as pl
from jax.experimental.pallas import tpu as pltpu


# --------------------------------------------------------------------------
# Kernels
# --------------------------------------------------------------------------
def _readout_masked_kernel(seq_ref, msk_ref, scale_ref, out_ref, acc_ref):
    # seq_ref: (B, TN, TD), msk_ref: (B, TN), scale_ref: (1,1) SMEM f32,
    # out_ref: (B, TD), acc_ref: (B, TD) f32 VMEM scratch.
    ni = pl.program_id(1)

    @pl.when(ni == 0)
    def _init():
        acc_ref[...] = jnp.zeros_like(acc_ref)

    seq = seq_ref[...].astype(jnp.float32)            # (B, TN, TD)
    msk = msk_ref[...].astype(jnp.float32)            # (B, TN)
    acc_ref[...] += jnp.sum(seq * msk[:, :, None], axis=1)   # partial sum

    @pl.when(ni == pl.num_programs(1) - 1)
    def _finalize():
        # scale = 1 / (N * sum(msk)) precomputed in the wrapper.
        out_ref[...] = (acc_ref[...] * scale_ref[0, 0]).astype(out_ref.dtype)


def _readout_mean_kernel(seq_ref, scale_ref, out_ref, acc_ref):
    ni = pl.program_id(1)

    @pl.when(ni == 0)
    def _init():
        acc_ref[...] = jnp.zeros_like(acc_ref)

    acc_ref[...] += jnp.sum(seq_ref[...].astype(jnp.float32), axis=1)

    @pl.when(ni == pl.num_programs(1) - 1)
    def _finalize():
        # scale = 1 / N
        out_ref[...] = (acc_ref[...] * scale_ref[0, 0]).astype(out_ref.dtype)


# --------------------------------------------------------------------------
# Wrapper
# --------------------------------------------------------------------------
def _pick_d_tile(d, target=512, quantum=128):
    """Lane-dense D tile: full D if small, else a 128-multiple divisor <= target."""
    if d <= target:
        return d
    t = (target // quantum) * quantum
    while t >= quantum:
        if d % t == 0:
            return t
        t -= quantum
    return d  # fallback: single tile along D


def readout(seq, msk=None, *, tn_max=512):
    """Pallas equivalent of Readout.forward(seq, msk)."""
    B, N, D = seq.shape
    out_dtype = seq.dtype

    # ---- N (reduction axis) tiling; zero padding contributes nothing. ----
    if N <= tn_max:
        tn, n_pad = N, N
    else:
        tn = tn_max
        n_pad = pl.cdiv(N, tn) * tn
    if n_pad != N:
        seq = jnp.pad(seq, ((0, 0), (0, n_pad - N), (0, 0)))
        if msk is not None:
            msk = jnp.pad(msk, ((0, 0), (0, n_pad - N)))
    n_tiles = n_pad // tn

    td = _pick_d_tile(D)
    d_tiles = D // td

    compiler_params = pltpu.CompilerParams(
        dimension_semantics=("parallel", "arbitrary"),  # D tiles parallel, N reduce
        vmem_limit_bytes=32 * 1024 * 1024,              # safe on v5e/v6e/v7x
    )
    out_shape = jax.ShapeDtypeStruct((B, D), out_dtype)
    seq_spec = pl.BlockSpec((B, tn, td), lambda di, ni: (0, ni, di))
    out_spec = pl.BlockSpec((B, td), lambda di, ni: (0, di))
    smem_spec = pl.BlockSpec(memory_space=pltpu.MemorySpace.SMEM)
    scratch = [pltpu.VMEM((B, td), jnp.float32)]

    if msk is None:
        scale = jnp.full((1, 1), 1.0 / N, dtype=jnp.float32)
        grid_spec = pltpu.PrefetchScalarGridSpec(
            num_scalar_prefetch=0,
            grid=(d_tiles, n_tiles),
            in_specs=[seq_spec, smem_spec],
            out_specs=out_spec,
            scratch_shapes=scratch,
        )
        return pl.pallas_call(
            _readout_mean_kernel,
            out_shape=out_shape,
            grid_spec=grid_spec,
            compiler_params=compiler_params,
        )(seq, scale)

    assert msk.shape == (B, n_pad)
    # torch.sum(msk): a single scalar over all batches (matches the module).
    total = jnp.sum(msk.astype(jnp.float32))
    scale = (1.0 / (jnp.float32(N) * total)).reshape(1, 1)  # inf/NaN if total==0, like torch

    msk_spec = pl.BlockSpec((B, tn), lambda di, ni: (0, ni))
    grid_spec = pltpu.PrefetchScalarGridSpec(
        num_scalar_prefetch=0,
        grid=(d_tiles, n_tiles),
        in_specs=[seq_spec, msk_spec, smem_spec],
        out_specs=out_spec,
        scratch_shapes=scratch,
    )
    return pl.pallas_call(
        _readout_masked_kernel,
        out_shape=out_shape,
        grid_spec=grid_spec,
        compiler_params=compiler_params,
    )(seq, msk, scale)


# --------------------------------------------------------------------------
# Reference + test
# --------------------------------------------------------------------------
def _reference(seq, msk):
    if msk is None:
        return jnp.mean(seq, axis=1)
    m = msk[:, :, None]
    return jnp.mean(seq * m, axis=1) / jnp.sum(m)


if __name__ == "__main__":
    key = jax.random.PRNGKey(0)
    k1, k2, k3, k4 = jax.random.split(key, 4)

    # --- small shapes matching the module's forward: (B, N, D) ---
    B, N, D = 2, 8, 32
    seq = jax.random.normal(k1, (B, N, D), dtype=jnp.float32)
    msk = (jax.random.uniform(k2, (B, N)) > 0.3).astype(jnp.float32)

    out_masked = jax.block_until_ready(readout(seq, msk))
    ref_masked = _reference(seq, msk)
    assert out_masked.shape == (B, D)
    assert jnp.allclose(out_masked, ref_masked, atol=1e-5, rtol=1e-5)

    out_plain = jax.block_until_ready(readout(seq, None))
    ref_plain = _reference(seq, None)
    assert out_plain.shape == (B, D)
    assert jnp.allclose(out_plain, ref_plain, atol=1e-5, rtol=1e-5)

    # --- second shape exercising the tiled/padded reduction path ---
    B2, N2, D2 = 2, 640, 256    # N2 > 512 -> two N tiles (with zero padding)
    seq2 = jax.random.normal(k3, (B2, N2, D2), dtype=jnp.float32)
    msk2 = (jax.random.uniform(k4, (B2, N2)) > 0.5).astype(jnp.float32)

    out2 = jax.block_until_ready(readout(seq2, msk2))
    assert jnp.allclose(out2, _reference(seq2, msk2), atol=1e-4, rtol=1e-4)

    out2p = jax.block_until_ready(readout(seq2, None))
    assert jnp.allclose(out2p, _reference(seq2, None), atol=1e-4, rtol=1e-4)

    print("KERNEL_OK")
</pallas_src>

<mosaic_0001>
module attributes {stable_mosaic.version = 11 : i64} {
  func.func @_readout_masked_kernel(%arg0: i32, %arg1: i32, %arg2: memref<2x8x32xf32, #tpu.memory_space<vmem>>, %arg3: memref<2x8xf32, #tpu.memory_space<vmem>>, %arg4: memref<1x1xf32, #tpu.memory_space<smem>>, %arg5: memref<2x32xf32, #tpu.memory_space<vmem>>, %arg6: memref<2x32xf32, #tpu.memory_space<vmem>>) attributes {dimension_semantics = [#tpu.dimension_semantics<parallel>, #tpu.dimension_semantics<arbitrary>], iteration_bounds = array<i64: 1, 1>, scalar_prefetch = 0 : i64, scratch_operands = 1 : i64, tpu.core_type = #tpu.core_type<tc>, window_params = [{transform_indices = @transform_0, window_bounds = array<i64: 2, 8, 32>}, {transform_indices = @transform_1, window_bounds = array<i64: 2, 8>}, {transform_indices = @transform_2, window_bounds = array<i64: 1, 1>}, {transform_indices = @transform_3, window_bounds = array<i64: 2, 32>}]} {
    %c0_i32 = arith.constant 0 : i32
    %0 = arith.cmpi eq, %arg1, %c0_i32 : i32
    %1 = arith.extui %0 : i1 to i32
    %c0_i32_0 = arith.constant 0 : i32
    %2 = arith.cmpi ne, %1, %c0_i32_0 : i32
    scf.if %2 {
      %cst_11 = arith.constant 0.000000e+00 : f32
      %15 = vector.broadcast %cst_11 : f32 to vector<2x32xf32>
      %c0_12 = arith.constant 0 : index
      %c0_13 = arith.constant 0 : index
      %16 = vector.load %arg6[%c0_12, %c0_13] : memref<2x32xf32, #tpu.memory_space<vmem>>, vector<2x32xf32>
      tpu.vector_store %arg6[%c0_12, %c0_13], %15 {strides = array<i32>} : memref<2x32xf32, #tpu.memory_space<vmem>>, vector<2x32xf32>,
    } else {
    }
    %c0 = arith.constant 0 : index
    %c0_1 = arith.constant 0 : index
    %c0_2 = arith.constant 0 : index
    %3 = vector.load %arg2[%c0, %c0_1, %c0_2] : memref<2x8x32xf32, #tpu.memory_space<vmem>>, vector<2x8x32xf32>
    %c0_3 = arith.constant 0 : index
    %c0_4 = arith.constant 0 : index
    %4 = vector.load %arg3[%c0_3, %c0_4] : memref<2x8xf32, #tpu.memory_space<vmem>>, vector<2x8xf32>
    %c0_5 = arith.constant 0 : index
    %c0_6 = arith.constant 0 : index
    %5 = vector.load %arg6[%c0_5, %c0_6] : memref<2x32xf32, #tpu.memory_space<vmem>>, vector<2x32xf32>
    %6 = vector.shape_cast %4 : vector<2x8xf32> to vector<2x8x1xf32>
    %7 = vector.broadcast %6 : vector<2x8x1xf32> to vector<2x8x32xf32>
    %8 = arith.mulf %3, %7 : vector<2x8x32xf32>
    %cst = arith.constant dense<0.000000e+00> : vector<2x32xf32>
    %9 = vector.multi_reduction <add>, %8, %cst [1] : vector<2x8x32xf32> to vector<2x32xf32>
    %10 = arith.addf %5, %9 : vector<2x32xf32>
    %c0_7 = arith.constant 0 : index
    %c0_8 = arith.constant 0 : index
    %11 = vector.load %arg6[%c0_7, %c0_8] : memref<2x32xf32, #tpu.memory_space<vmem>>, vector<2x32xf32>
    tpu.vector_store %arg6[%c0_7, %c0_8], %10 {strides = array<i32>} : memref<2x32xf32, #tpu.memory_space<vmem>>, vector<2x32xf32>,
    %c0_i32_9 = arith.constant 0 : i32
    %12 = arith.cmpi eq, %arg1, %c0_i32_9 : i32
    %13 = arith.extui %12 : i1 to i32
    %c0_i32_10 = arith.constant 0 : i32
    %14 = arith.cmpi ne, %13, %c0_i32_10 : i32
    scf.if %14 {
      %c0_11 = arith.constant 0 : index
      %c0_12 = arith.constant 0 : index
      %15 = vector.load %arg6[%c0_11, %c0_12] : memref<2x32xf32, #tpu.memory_space<vmem>>, vector<2x32xf32>
      %c0_13 = arith.constant 0 : index
      %c0_14 = arith.constant 0 : index
      %16 = memref.load %arg4[%c0_13, %c0_14] : memref<1x1xf32, #tpu.memory_space<smem>>
      %17 = vector.broadcast %16 : f32 to vector<2x32xf32>
      %18 = arith.mulf %15, %17 : vector<2x32xf32>
      %c0_15 = arith.constant 0 : index
      %c0_16 = arith.constant 0 : index
      %19 = vector.load %arg5[%c0_15, %c0_16] : memref<2x32xf32, #tpu.memory_space<vmem>>, vector<2x32xf32>
      tpu.vector_store %arg5[%c0_15, %c0_16], %18 {strides = array<i32>} : memref<2x32xf32, #tpu.memory_space<vmem>>, vector<2x32xf32>,
    } else {
    }
    return
  }
  func.func @transform_0(%arg0: i32, %arg1: i32) -> (i32, i32, i32) {
    %c0_i32 = arith.constant 0 : i32
    %c0_i32_0 = arith.constant 0 : i32
    return %c0_i32, %arg1, %arg0 : i32, i32, i32
  }
  func.func @transform_1(%arg0: i32, %arg1: i32) -> (i32, i32) {
    %c0_i32 = arith.constant 0 : i32
    %c0_i32_0 = arith.constant 0 : i32
    return %c0_i32, %arg1 : i32, i32
  }
  func.func @transform_2(%arg0: i32, %arg1: i32) -> (i32, i32) {
    %c0_i32 = arith.constant 0 : i32
    %c0_i32_0 = arith.constant 0 : i32
    %c0_i32_1 = arith.constant 0 : i32
    return %c0_i32, %c0_i32_0 : i32, i32
  }
  func.func @transform_3(%arg0: i32, %arg1: i32) -> (i32, i32) {
    %c0_i32 = arith.constant 0 : i32
    %c0_i32_0 = arith.constant 0 : i32
    return %c0_i32, %arg0 : i32, i32
  }
}

</mosaic_0001>

<bundles_post_ra>
// kernel: tpu_custom_call.1
= control target key start
LH: loop header
LB: loop body
LE: loop exit
PB: predicated region body
PF: predicated region fallthrough
CT: control target
= control target key end

     0   :  { %9 = vsyncpa [#allocation5], 0  ;;  %s204_s0 = inlined_call_operand.hbm [shape: f32[2,8,32], index: 0, kind: input, shape index: {}]   ;;  %s205_s1 = inlined_call_operand.vmem [shape: f32[2,8], index: 1, kind: input, shape index: {}]   ;;  %s206_s2 = inlined_call_operand.<no memory space> [shape: f32[1,1], index: 2, kind: input, shape index: {}]   ;;  %s207_s3 = inlined_call_operand.hbm [shape: f32[2,32], index: 3, kind: output, shape index: {}]  }
   0x1   :  { %10 = vsyncpa [#allocation6], 0  ;;  %s15_s14 = sshll.u32 %s204_s0, 4  ;;  %s164_s15 = smov [#allocation4]   ;;  %s16_s14 = int_to_ptr.hbm [resolvable:$true] %s15_s14 }
   0x2   :  { %s17_s16 = sshll.u32 %s164_s15, 4  ;;  %s165_s17 = smov 128   ;;  %s18_s16 = int_to_ptr.vmem [resolvable:$true] %s17_s16 }
   0x3   :  { %s166_s18 = smov 8  }
   0x4   :  { %23 = dma.hbm_to_vmem [thread:$0]  %s16_s14, 256, %s18_s16, [#allocation5], %s165_s17, %s165_s17, %s166_s18  }
   0x5   :  { %160 = dma.done.wait [#allocation5], 256  }
   0x6   :  { %161 = vsyncadd [#allocation5], 4294967040  ;;  %v43_v0 = vlaneseq  ;;  %v40_v2 = vld [vmem:[%s205_s1] sm:$0x3]  ;;  %vm36_vm0 = vcmask 254976   ;;  %v167_v5 = vmov 0.0   ;;  %v86_v29 = vstv %s206_s2 }
   0x7   :  { %v42_v3 = vperm.slane %v40_v2, 0  ;;  %v49_v4 = vperm.slane %v40_v2, 1  ;;  %37 = vst.msk [vmem:[#allocation2] sm:$0x3] %vm36_vm0, %v167_v5  ;;  %v38_v6 = vld [vmem:[#allocation4] sm:$0xff]  ;;  %vm58_vm1 = vcmask 261120  }
   0x8   :  { %v44_v1 = vshrl.u32 %v43_v0, 7  ;;  %v39_v12 = vld [vmem:[#allocation4 + $0x8] sm:$0xff]  ;;  %vm75_vm2 = vcmask 1041409   ;;  %s168_s21 = smov [#allocation7]   ;;  %s96_s25 = sshll.u32 %s207_s3, 4  ;;  %s97_s25 = int_to_ptr.hbm [resolvable:$true] %s96_s25 }
   0x9   :  { %s94_s22 = sshll.u32 %s168_s21, 4  ;;  %s95_s22 = int_to_ptr.vmem [resolvable:$true] %s94_s22 }
   0xa   :  { %111 = vset.pattern.permute.xlu0 %v44_v1 }
   0xe   :  { %v41_v26 = vld [vmem:[#allocation2] sm:$0x3] }
  0x12   :  { %47 = vperm.xlu0 %111, %v42_v3  }
  0x1a   :  { %54 = vperm.xlu0 %111, %v49_v4  }
  0x84   :  { %v48_v7 = vpop.permute.xlu0 %47 }
  0x85   :  { %v56_v8 = vmul.f32 %v48_v7, %v38_v6 }
  0x87   :  { %v59_v9 = vsel %vm58_vm1, %v56_v8, 0.0 }
  0x88   :  { %v60_v10 = vrot.slane %v59_v9, 4 }
  0x8a   :  { %v61_v11 = vadd.f32 %v60_v10, %v59_v9 }
  0x8c   :  { %v55_v13 = vpop.permute.xlu0 %54  ;;  %v62_v15 = vrot.slane %v61_v11, 2 }
  0x8d   :  { %v57_v14 = vmul.f32 %v55_v13, %v39_v12 }
  0x8e   :  { %v63_v18 = vadd.f32 %v62_v15, %v61_v11 }
  0x8f   :  { %v66_v16 = vsel %vm58_vm1, %v57_v14, 0.0 }
  0x90   :  { %v67_v17 = vrot.slane %v66_v16, 4  ;;  %v64_v21 = vrot.slane %v63_v18, 1 }
  0x92   :  { %v68_v19 = vadd.f32 %v67_v17, %v66_v16  ;;  %v65_v24 = vadd.f32 %v64_v21, %v63_v18 }
  0x94   :  { %v69_v20 = vrot.slane %v68_v19, 2 }
  0x96   :  { %v70_v22 = vadd.f32 %v69_v20, %v68_v19 }
  0x98   :  { %v71_v23 = vrot.slane %v70_v22, 1 }
  0x9a   :  { %v72_v25 = vadd.f32 %v71_v23, %v70_v22 }
  0x9c   :  { %v76_v27 = vsel %vm75_vm2, %v72_v25, %v65_v24 }
  0x9d   :  { %v78_v28 = vadd.f32 %v76_v27, %v41_v26 }
  0x9f   :  { %80 = vst.msk [vmem:[#allocation2] sm:$0x3] %vm36_vm0, %v78_v28 }
  0xa6   :  { %v84_v30 = vld [vmem:[#allocation2] sm:$0x3] }
  0xa7   :  { %v87_v31 = vmul.f32 %v86_v29, %v84_v30 }
  0xa9   :  { %88 = vst.msk [vmem:[#allocation7] sm:$0x3] %vm36_vm0, %v87_v31 }
  0xaa   :  { %99 = dma.vmem_to_hbm [thread:$0]  %s95_s22, 32, %s97_s25, [#allocation6]  }
  0xab   :  { %162 = dma.done.wait [#allocation6], 32  }
  0xac   :  { %163 = vsyncadd [#allocation6], 4294967264 }
  0xad   :  { %104 = vsyncpa [#allocation5], 1 }
  0xae   :  { %105 = vsyncpa [#allocation6], 1 }

</bundles_post_ra>
